<compile_context>
chip_gen: v5e
topology: v5e:2x2
jax: 0.10.0
libtpu: 0.0.40
codegen_flags: <defaults>
</compile_context>

<pallas_src>
import functools

import jax
import jax.numpy as jnp
from jax.experimental import pallas as pl
from jax.experimental.pallas import tpu as pltpu


def _round_up(x, m):
    return ((x + m - 1) // m) * m


def _tpu_vmem_and_cores():
    """Returns (physical VMEM bytes per core, chip-has-2-tensorcores)."""
    vmem = 64 * 1024 * 1024          # conservative default (v7x per-TC size)
    multicore = False
    try:
        vmem = int(pltpu.get_tpu_info().vmem_capacity_bytes)
    except Exception:
        pass
    try:
        kind = jax.devices()[0].device_kind.lower()
        multicore = ("v7" in kind) or ("tpu7" in kind)
    except Exception:
        pass
    return vmem, multicore


# ---------------------------------------------------------------------------
# Fused whole-MLP kernel: grid over batch tiles only, layers looped in-kernel.
# Weights/biases stay resident in VMEM; activations never touch HBM.
# ---------------------------------------------------------------------------
def _fused_mlp_kernel(n_layers, has_bias, x_ref, *refs):
    o_ref = refs[-1]
    params = refs[:-1]
    step = 2 if has_bias else 1
    h = x_ref[...]                                  # compute dtype (bf16/f32)
    for l in range(n_layers):
        w = params[l * step][...]
        y = jnp.dot(h, w, preferred_element_type=jnp.float32)   # f32 accumulate
        if has_bias:
            y = y + params[l * step + 1][...].astype(jnp.float32)
        if l < n_layers - 1:                        # ReLU after every layer but last
            y = jnp.maximum(y, 0.0)
            h = y.astype(w.dtype)                   # back to MXU dtype for next dot
        else:
            h = y
    o_ref[...] = h.astype(o_ref.dtype)


# ---------------------------------------------------------------------------
# Tiled single-layer kernel: (M, N, K) grid + f32 accumulator in VMEM.
# ---------------------------------------------------------------------------
def _linear_tiled_kernel(apply_relu, has_bias, *refs):
    if has_bias:
        x_ref, w_ref, b_ref, o_ref, acc_ref = refs
    else:
        x_ref, w_ref, o_ref, acc_ref = refs
        b_ref = None
    k = pl.program_id(2)

    @pl.when(k == 0)
    def _():
        acc_ref[...] = jnp.zeros_like(acc_ref)

    acc_ref[...] += jnp.dot(x_ref[...], w_ref[...],
                            preferred_element_type=jnp.float32)

    @pl.when(k == pl.num_programs(2) - 1)
    def _():
        y = acc_ref[...]
        if has_bias:
            y = y + b_ref[...].astype(jnp.float32)
        if apply_relu:
            y = jnp.maximum(y, 0.0)
        o_ref[...] = y.astype(o_ref.dtype)


def _pick_tile(dim):
    for t in (512, 256, 128):
        if dim % t == 0:
            return t
    return dim


def linear_pallas_tiled(x, w_t, bias, apply_relu, *, tm, out_dtype, vmem_limit):
    """y = x @ w_t (+ bias) (+ ReLU). Inputs pre-padded: Mp % tm == 0,
    Kp/Np multiples of 128; w_t is (Kp, Np); bias is (1, Np) or None."""
    Mp, Kp = x.shape
    Np = w_t.shape[1]
    tn = _pick_tile(Np)
    tk = _pick_tile(Kp)
    grid = (Mp // tm, Np // tn, Kp // tk)
    has_bias = bias is not None

    in_specs = [
        pl.BlockSpec((tm, tk), lambda i, j, k: (i, k)),
        pl.BlockSpec((tk, tn), lambda i, j, k: (k, j)),
    ]
    args = [x, w_t]
    if has_bias:
        in_specs.append(pl.BlockSpec((1, tn), lambda i, j, k: (0, j)))
        args.append(bias)

    in_bytes = jnp.dtype(x.dtype).itemsize
    cost = pl.CostEstimate(
        flops=2 * Mp * Np * Kp,
        transcendentals=0,
        bytes_accessed=(Mp * Kp + Kp * Np) * in_bytes
        + Mp * Np * jnp.dtype(out_dtype).itemsize,
    )
    return pl.pallas_call(
        functools.partial(_linear_tiled_kernel, apply_relu, has_bias),
        out_shape=jax.ShapeDtypeStruct((Mp, Np), out_dtype),
        grid_spec=pltpu.PrefetchScalarGridSpec(
            num_scalar_prefetch=0,
            grid=grid,
            in_specs=in_specs,
            out_specs=pl.BlockSpec((tm, tn), lambda i, j, k: (i, j)),
            scratch_shapes=[pltpu.VMEM((tm, tn), jnp.float32)],
        ),
        compiler_params=pltpu.CompilerParams(
            dimension_semantics=("parallel", "parallel", "arbitrary"),
            vmem_limit_bytes=vmem_limit),
        cost_estimate=cost,
    )(*args)


# ---------------------------------------------------------------------------
# Module wrapper.
# ---------------------------------------------------------------------------
class MLP:
    """JAX/Pallas port of the PyTorch MLP: Linear -> ReLU -> ... -> Linear."""

    def __init__(self, sizes, bias=True, key=None, allow_fuse=True,
                 compute_dtype=jnp.bfloat16):
        if key is None:
            key = jax.random.PRNGKey(0)
        self.sizes = tuple(sizes)
        self.bias = bias
        self.allow_fuse = allow_fuse
        self.compute_dtype = jnp.dtype(compute_dtype)   # MXU operand dtype
        self.out_dtype = jnp.dtype(jnp.float32)          # final output dtype

        vmem_cap, self.multicore = _tpu_vmem_and_cores()
        # ~75% of physical VMEM (~96 MiB on v5e/v6e, ~48 MiB on v7x), leaving
        # headroom for Mosaic internal scratch.
        self._vmem_budget = (vmem_cap * 3) // 4

        self.weights = []      # original (N, K), PyTorch convention (for ref)
        self.biases = []
        self.w_t_pad = []      # (Kp, Np) transposed + zero-padded + bf16, ONCE
        self.b_pad = []        # (1, Np) zero-padded + bf16, or None
        for i in range(len(sizes) - 1):
            key, wk, bk = jax.random.split(key, 3)
            fan_in, fan_out = sizes[i], sizes[i + 1]
            bound = 1.0 / (fan_in ** 0.5)
            w = jax.random.uniform(wk, (fan_out, fan_in), jnp.float32,
                                   -bound, bound)
            b = (jax.random.uniform(bk, (fan_out,), jnp.float32, -bound, bound)
                 if bias else None)
            self.weights.append(w)
            self.biases.append(b)
            Kp, Np = _round_up(fan_in, 128), _round_up(fan_out, 128)
            w_t = jnp.zeros((Kp, Np), jnp.float32).at[:fan_in, :fan_out].set(w.T)
            self.w_t_pad.append(w_t.astype(self.compute_dtype))
            self.b_pad.append(
                (jnp.zeros((1, Np), jnp.float32).at[0, :fan_out].set(b)
                 ).astype(self.compute_dtype) if bias else None)

    # -- helpers -----------------------------------------------------------
    def _batch_tile(self, M):
        sub = 16 if self.compute_dtype.itemsize == 2 else 8   # bf16 packs 2/sublane
        cap = 512
        if M <= cap:
            if self.multicore and M >= 2 * sub:
                # v7x: >=2 batch tiles so "parallel" shards across both TCs.
                tm = _round_up(-(-M // 2), sub)
                return tm, 2 * tm
            tm = _round_up(M, sub)
            return tm, tm
        return cap, _round_up(M, cap)

    def _fused_fits(self, tm):
        p = self.compute_dtype.itemsize
        need = 0
        for w in self.w_t_pad:
            need += w.size * p                      # single-buffered (grid-invariant)
        for b in self.b_pad:
            if b is not None:
                need += b.size * p
        widths = [w.shape[0] for w in self.w_t_pad] + [self.w_t_pad[-1].shape[1]]
        need += 2 * tm * widths[0] * p              # double-buffered input tile
        need += 2 * tm * widths[-1] * self.out_dtype.itemsize  # double-buffered out
        need += 2 * tm * max(widths) * 4            # live f32 intermediates (h, y)
        need += 2 * 1024 * 1024                     # compiler-scratch margin
        return need <= self._vmem_budget

    # -- forward paths -----------------------------------------------------
    def _forward_fused(self, xp, tm, single_buffer_weights=True):
        Mp, K0p = xp.shape
        NLp = self.w_t_pad[-1].shape[1]
        n_layers = len(self.w_t_pad)
        has_bias = self.bias
        p = self.compute_dtype.itemsize

        # Grid-invariant params (index_map always (0,0)) -> single VMEM copy.
        wkw = {}
        if single_buffer_weights:
            wkw = dict(pipeline_mode=pl.Buffered(1))

        args = [xp]
        in_specs = [pl.BlockSpec((tm, K0p), lambda i: (i, 0))]
        flops = 0
        bytes_accessed = xp.size * p + Mp * NLp * self.out_dtype.itemsize
        for l in range(n_layers):
            w = self.w_t_pad[l]
            args.append(w)
            in_specs.append(pl.BlockSpec(w.shape, lambda i: (0, 0), **wkw))
            flops += 2 * Mp * w.shape[0] * w.shape[1]
            bytes_accessed += w.size * p
            if has_bias:
                b = self.b_pad[l]
                args.append(b)
                in_specs.append(pl.BlockSpec(b.shape, lambda i: (0, 0), **wkw))
                bytes_accessed += b.size * p

        return pl.pallas_call(
            functools.partial(_fused_mlp_kernel, n_layers, has_bias),
            out_shape=jax.ShapeDtypeStruct((Mp, NLp), self.out_dtype),
            grid_spec=pltpu.PrefetchScalarGridSpec(
                num_scalar_prefetch=0,
                grid=(Mp // tm,),
                in_specs=in_specs,
                out_specs=pl.BlockSpec((tm, NLp), lambda i: (i, 0)),
            ),
            compiler_params=pltpu.CompilerParams(
                dimension_semantics=("parallel",),
                vmem_limit_bytes=self._vmem_budget),
            cost_estimate=pl.CostEstimate(
                flops=flops, transcendentals=0, bytes_accessed=bytes_accessed),
        )(*args)

    def _forward_layered(self, xp, tm):
        # TODO(synk): weight-streaming fused variant (activations resident in
        # VMEM, weights streamed from HBM with emit_pipeline) for MLPs that
        # exceed the fused VMEM budget; current fallback round-trips
        # intermediate activations through HBM.
        n_layers = len(self.w_t_pad)
        h = xp
        for l in range(n_layers):
            last = (l == n_layers - 1)
            h = linear_pallas_tiled(
                h, self.w_t_pad[l], self.b_pad[l],
                apply_relu=not last, tm=tm,
                out_dtype=(self.out_dtype if last else self.compute_dtype),
                vmem_limit=self._vmem_budget)
        return h

    def __call__(self, x):
        M, K = x.shape
        assert K == self.sizes[0]
        tm, Mp = self._batch_tile(M)
        K0p = self.w_t_pad[0].shape[0]
        # Zero-pad once: lane-dense blocks everywhere, math unchanged.
        xp = jnp.zeros((Mp, K0p), self.compute_dtype).at[:M, :K].set(
            x.astype(self.compute_dtype))

        if self.allow_fuse and self._fused_fits(tm):
            try:
                out = self._forward_fused(xp, tm, single_buffer_weights=True)
            except Exception:
                try:   # pl.Buffered(1) unsupported -> default double buffering
                    out = self._forward_fused(xp, tm, single_buffer_weights=False)
                except Exception:
                    out = self._forward_layered(xp, tm)
        else:
            out = self._forward_layered(xp, tm)
        return out[:M, :self.sizes[-1]].astype(x.dtype)


if __name__ == "__main__":
    key = jax.random.PRNGKey(0)
    batch = 8
    sizes = (32, 64, 16)

    key, xk, mk = jax.random.split(key, 3)
    x = jax.random.normal(xk, (batch, sizes[0]), jnp.float32)

    def reference(x, mlp):
        # dtype-matched reference: params & inter-layer activations rounded to
        # the kernel's compute dtype, math in f32 (matches the kernel's
        # bf16-operand / f32-accumulate scheme).
        cd = mlp.compute_dtype
        h = x
        n = len(mlp.weights)
        for i in range(n):
            w = mlp.weights[i].astype(cd).astype(jnp.float32)
            h = h.astype(cd).astype(jnp.float32) @ w.T
            if mlp.biases[i] is not None:
                h = h + mlp.biases[i].astype(cd).astype(jnp.float32)
            if i < n - 1:
                h = jnp.maximum(h, 0.0)
        return h

    # 1) bf16 fused single-kernel path (all weights resident in VMEM).
    mlp_fused = MLP(sizes, bias=True, key=mk, allow_fuse=True)
    out_fused = jax.block_until_ready(mlp_fused(x))
    assert out_fused.shape == (batch, sizes[-1])
    assert jnp.allclose(out_fused, reference(x, mlp_fused), atol=2e-2, rtol=2e-2)

    # 2) bf16 tiled per-layer fallback path (exercised explicitly).
    mlp_tiled = MLP(sizes, bias=True, key=mk, allow_fuse=False)
    out_tiled = jax.block_until_ready(mlp_tiled(x))
    assert jnp.allclose(out_tiled, reference(x, mlp_tiled), atol=2e-2, rtol=2e-2)

    # 3) f32 precision mode (tight parity with plain f32 math).
    mlp_f32 = MLP(sizes, bias=True, key=mk, allow_fuse=True,
                  compute_dtype=jnp.float32)
    out_f32 = jax.block_until_ready(mlp_f32(x))
    assert jnp.allclose(out_f32, reference(x, mlp_f32), atol=1e-5, rtol=1e-5)

    # 4) bias=False variant (bias DMA/add skipped entirely).
    mlp_nobias = MLP(sizes, bias=False, key=mk, allow_fuse=False)
    out_nb = jax.block_until_ready(mlp_nobias(x))
    assert jnp.allclose(out_nb, reference(x, mlp_nobias), atol=2e-2, rtol=2e-2)

    print("KERNEL_OK")
</pallas_src>

<mosaic_0001>
module attributes {stable_mosaic.version = 11 : i64} {
  func.func @_fused_mlp_kernel(%arg0: i32, %arg1: memref<16x128xbf16, #tpu.memory_space<vmem>>, %arg2: memref<128x128xbf16, #tpu.memory_space<vmem>>, %arg3: memref<1x128xbf16, #tpu.memory_space<vmem>>, %arg4: memref<128x128xbf16, #tpu.memory_space<vmem>>, %arg5: memref<1x128xbf16, #tpu.memory_space<vmem>>, %arg6: memref<16x128xf32, #tpu.memory_space<vmem>>) attributes {dimension_semantics = [#tpu.dimension_semantics<parallel>], iteration_bounds = array<i64: 1>, scalar_prefetch = 0 : i64, scratch_operands = 0 : i64, tpu.core_type = #tpu.core_type<tc>, window_params = [{transform_indices = @transform_0, window_bounds = array<i64: 16, 128>}, {pipeline_mode = #tpu.pipeline_mode<synchronous>, transform_indices = @transform_1, window_bounds = array<i64: 128, 128>}, {pipeline_mode = #tpu.pipeline_mode<synchronous>, transform_indices = @transform_2, window_bounds = array<i64: 1, 128>}, {pipeline_mode = #tpu.pipeline_mode<synchronous>, transform_indices = @transform_3, window_bounds = array<i64: 128, 128>}, {pipeline_mode = #tpu.pipeline_mode<synchronous>, transform_indices = @transform_4, window_bounds = array<i64: 1, 128>}, {transform_indices = @transform_5, window_bounds = array<i64: 16, 128>}]} {
    %c0 = arith.constant 0 : index
    %c0_0 = arith.constant 0 : index
    %0 = vector.load %arg1[%c0, %c0_0] : memref<16x128xbf16, #tpu.memory_space<vmem>>, vector<16x128xbf16>
    %c0_1 = arith.constant 0 : index
    %c0_2 = arith.constant 0 : index
    %1 = vector.load %arg2[%c0_1, %c0_2] : memref<128x128xbf16, #tpu.memory_space<vmem>>, vector<128x128xbf16>
    %cst = arith.constant dense<0.000000e+00> : vector<16x128xf32>
    %2 = tpu.matmul %0, %1, %cst {dimension_numbers = #tpu.dot_dimension_numbers<[1], [0], [0], [1], [0, 0, 1, 1], [], []>} : vector<16x128xbf16>, vector<128x128xbf16>, vector<16x128xf32> -> vector<16x128xf32>
    %c0_3 = arith.constant 0 : index
    %c0_4 = arith.constant 0 : index
    %3 = vector.load %arg3[%c0_3, %c0_4] : memref<1x128xbf16, #tpu.memory_space<vmem>>, vector<1x128xbf16>
    %4 = arith.extf %3 : vector<1x128xbf16> to vector<1x128xf32>
    %5 = vector.broadcast %4 : vector<1x128xf32> to vector<16x128xf32>
    %6 = arith.addf %2, %5 : vector<16x128xf32>
    %cst_5 = arith.constant 0.000000e+00 : f32
    %7 = vector.broadcast %cst_5 : f32 to vector<16x128xf32>
    %8 = arith.maximumf %6, %7 : vector<16x128xf32>
    %9 = arith.truncf %8 : vector<16x128xf32> to vector<16x128xbf16>
    %c0_6 = arith.constant 0 : index
    %c0_7 = arith.constant 0 : index
    %10 = vector.load %arg4[%c0_6, %c0_7] : memref<128x128xbf16, #tpu.memory_space<vmem>>, vector<128x128xbf16>
    %cst_8 = arith.constant dense<0.000000e+00> : vector<16x128xf32>
    %11 = tpu.matmul %9, %10, %cst_8 {dimension_numbers = #tpu.dot_dimension_numbers<[1], [0], [0], [1], [0, 0, 1, 1], [], []>} : vector<16x128xbf16>, vector<128x128xbf16>, vector<16x128xf32> -> vector<16x128xf32>
    %c0_9 = arith.constant 0 : index
    %c0_10 = arith.constant 0 : index
    %12 = vector.load %arg5[%c0_9, %c0_10] : memref<1x128xbf16, #tpu.memory_space<vmem>>, vector<1x128xbf16>
    %13 = arith.extf %12 : vector<1x128xbf16> to vector<1x128xf32>
    %14 = vector.broadcast %13 : vector<1x128xf32> to vector<16x128xf32>
    %15 = arith.addf %11, %14 : vector<16x128xf32>
    %c0_11 = arith.constant 0 : index
    %c0_12 = arith.constant 0 : index
    %16 = vector.load %arg6[%c0_11, %c0_12] : memref<16x128xf32, #tpu.memory_space<vmem>>, vector<16x128xf32>
    tpu.vector_store %arg6[%c0_11, %c0_12], %15 {strides = array<i32>} : memref<16x128xf32, #tpu.memory_space<vmem>>, vector<16x128xf32>,
    return
  }
  func.func @transform_0(%arg0: i32) -> (i32, i32) {
    %c0_i32 = arith.constant 0 : i32
    %c0_i32_0 = arith.constant 0 : i32
    return %arg0, %c0_i32 : i32, i32
  }
  func.func @transform_1(%arg0: i32) -> (i32, i32) {
    %c0_i32 = arith.constant 0 : i32
    %c0_i32_0 = arith.constant 0 : i32
    %c0_i32_1 = arith.constant 0 : i32
    return %c0_i32, %c0_i32_0 : i32, i32
  }
  func.func @transform_2(%arg0: i32) -> (i32, i32) {
    %c0_i32 = arith.constant 0 : i32
    %c0_i32_0 = arith.constant 0 : i32
    %c0_i32_1 = arith.constant 0 : i32
    return %c0_i32, %c0_i32_0 : i32, i32
  }
  func.func @transform_3(%arg0: i32) -> (i32, i32) {
    %c0_i32 = arith.constant 0 : i32
    %c0_i32_0 = arith.constant 0 : i32
    %c0_i32_1 = arith.constant 0 : i32
    return %c0_i32, %c0_i32_0 : i32, i32
  }
  func.func @transform_4(%arg0: i32) -> (i32, i32) {
    %c0_i32 = arith.constant 0 : i32
    %c0_i32_0 = arith.constant 0 : i32
    %c0_i32_1 = arith.constant 0 : i32
    return %c0_i32, %c0_i32_0 : i32, i32
  }
  func.func @transform_5(%arg0: i32) -> (i32, i32) {
    %c0_i32 = arith.constant 0 : i32
    %c0_i32_0 = arith.constant 0 : i32
    return %arg0, %c0_i32 : i32, i32
  }
}

module attributes {stable_mosaic.version = 11 : i64} {
  func.func @_fused_mlp_kernel(%arg0: i32, %arg1: memref<16x128xbf16, #tpu.memory_space<vmem>>, %arg2: memref<128x128xbf16, #tpu.memory_space<vmem>>, %arg3: memref<1x128xbf16, #tpu.memory_space<vmem>>, %arg4: memref<128x128xbf16, #tpu.memory_space<vmem>>, %arg5: memref<1x128xbf16, #tpu.memory_space<vmem>>, %arg6: memref<16x128xf32, #tpu.memory_space<vmem>>) attributes {dimension_semantics = [#tpu.dimension_semantics<parallel>], iteration_bounds = array<i64: 1>, scalar_prefetch = 0 : i64, scratch_operands = 0 : i64, tpu.core_type = #tpu.core_type<tc>, window_params = [{transform_indices = @transform_0, window_bounds = array<i64: 16, 128>}, {pipeline_mode = #tpu.pipeline_mode<synchronous>, transform_indices = @transform_1, window_bounds = array<i64: 128, 128>}, {pipeline_mode = #tpu.pipeline_mode<synchronous>, transform_indices = @transform_2, window_bounds = array<i64: 1, 128>}, {pipeline_mode = #tpu.pipeline_mode<synchronous>, transform_indices = @transform_3, window_bounds = array<i64: 128, 128>}, {pipeline_mode = #tpu.pipeline_mode<synchronous>, transform_indices = @transform_4, window_bounds = array<i64: 1, 128>}, {transform_indices = @transform_5, window_bounds = array<i64: 16, 128>}]} {
    %c0 = arith.constant 0 : index
    %c0_0 = arith.constant 0 : index
    %0 = vector.load %arg1[%c0, %c0_0] : memref<16x128xbf16, #tpu.memory_space<vmem>>, vector<16x128xbf16>
    %c0_1 = arith.constant 0 : index
    %c0_2 = arith.constant 0 : index
    %1 = vector.load %arg2[%c0_1, %c0_2] : memref<128x128xbf16, #tpu.memory_space<vmem>>, vector<128x128xbf16>
    %cst = arith.constant dense<0.000000e+00> : vector<16x128xf32>
    %2 = tpu.matmul %0, %1, %cst {dimension_numbers = #tpu.dot_dimension_numbers<[1], [0], [0], [1], [0, 0, 1, 1], [], []>} : vector<16x128xbf16>, vector<128x128xbf16>, vector<16x128xf32> -> vector<16x128xf32>
    %c0_3 = arith.constant 0 : index
    %c0_4 = arith.constant 0 : index
    %3 = vector.load %arg3[%c0_3, %c0_4] : memref<1x128xbf16, #tpu.memory_space<vmem>>, vector<1x128xbf16>
    %4 = arith.extf %3 : vector<1x128xbf16> to vector<1x128xf32>
    %5 = vector.broadcast %4 : vector<1x128xf32> to vector<16x128xf32>
    %6 = arith.addf %2, %5 : vector<16x128xf32>
    %cst_5 = arith.constant 0.000000e+00 : f32
    %7 = vector.broadcast %cst_5 : f32 to vector<16x128xf32>
    %8 = arith.maximumf %6, %7 : vector<16x128xf32>
    %9 = arith.truncf %8 : vector<16x128xf32> to vector<16x128xbf16>
    %c0_6 = arith.constant 0 : index
    %c0_7 = arith.constant 0 : index
    %10 = vector.load %arg4[%c0_6, %c0_7] : memref<128x128xbf16, #tpu.memory_space<vmem>>, vector<128x128xbf16>
    %cst_8 = arith.constant dense<0.000000e+00> : vector<16x128xf32>
    %11 = tpu.matmul %9, %10, %cst_8 {dimension_numbers = #tpu.dot_dimension_numbers<[1], [0], [0], [1], [0, 0, 1, 1], [], []>} : vector<16x128xbf16>, vector<128x128xbf16>, vector<16x128xf32> -> vector<16x128xf32>
    %c0_9 = arith.constant 0 : index
    %c0_10 = arith.constant 0 : index
    %12 = vector.load %arg5[%c0_9, %c0_10] : memref<1x128xbf16, #tpu.memory_space<vmem>>, vector<1x128xbf16>
    %13 = arith.extf %12 : vector<1x128xbf16> to vector<1x128xf32>
    %14 = vector.broadcast %13 : vector<1x128xf32> to vector<16x128xf32>
    %15 = arith.addf %11, %14 : vector<16x128xf32>
    %c0_11 = arith.constant 0 : index
    %c0_12 = arith.constant 0 : index
    %16 = vector.load %arg6[%c0_11, %c0_12] : memref<16x128xf32, #tpu.memory_space<vmem>>, vector<16x128xf32>
    tpu.vector_store %arg6[%c0_11, %c0_12], %15 {strides = array<i32>} : memref<16x128xf32, #tpu.memory_space<vmem>>, vector<16x128xf32>,
    return
  }
  func.func @transform_0(%arg0: i32) -> (i32, i32) {
    %c0_i32 = arith.constant 0 : i32
    %c0_i32_0 = arith.constant 0 : i32
    return %arg0, %c0_i32 : i32, i32
  }
  func.func @transform_1(%arg0: i32) -> (i32, i32) {
    %c0_i32 = arith.constant 0 : i32
    %c0_i32_0 = arith.constant 0 : i32
    %c0_i32_1 = arith.constant 0 : i32
    return %c0_i32, %c0_i32_0 : i32, i32
  }
  func.func @transform_2(%arg0: i32) -> (i32, i32) {
    %c0_i32 = arith.constant 0 : i32
    %c0_i32_0 = arith.constant 0 : i32
    %c0_i32_1 = arith.constant 0 : i32
    return %c0_i32, %c0_i32_0 : i32, i32
  }
  func.func @transform_3(%arg0: i32) -> (i32, i32) {
    %c0_i32 = arith.constant 0 : i32
    %c0_i32_0 = arith.constant 0 : i32
    %c0_i32_1 = arith.constant 0 : i32
    return %c0_i32, %c0_i32_0 : i32, i32
  }
  func.func @transform_4(%arg0: i32) -> (i32, i32) {
    %c0_i32 = arith.constant 0 : i32
    %c0_i32_0 = arith.constant 0 : i32
    %c0_i32_1 = arith.constant 0 : i32
    return %c0_i32, %c0_i32_0 : i32, i32
  }
  func.func @transform_5(%arg0: i32) -> (i32, i32) {
    %c0_i32 = arith.constant 0 : i32
    %c0_i32_0 = arith.constant 0 : i32
    return %arg0, %c0_i32 : i32, i32
  }
}

module attributes {stable_mosaic.version = 11 : i64} {
  func.func @_linear_tiled_kernel(%arg0: i32, %arg1: i32, %arg2: i32, %arg3: memref<16x128xbf16, #tpu.memory_space<vmem>>, %arg4: memref<128x128xbf16, #tpu.memory_space<vmem>>, %arg5: memref<1x128xbf16, #tpu.memory_space<vmem>>, %arg6: memref<16x128xbf16, #tpu.memory_space<vmem>>, %arg7: memref<16x128xf32, #tpu.memory_space<vmem>>) attributes {dimension_semantics = [#tpu.dimension_semantics<parallel>, #tpu.dimension_semantics<parallel>, #tpu.dimension_semantics<arbitrary>], iteration_bounds = array<i64: 1, 1, 1>, scalar_prefetch = 0 : i64, scratch_operands = 1 : i64, tpu.core_type = #tpu.core_type<tc>, window_params = [{transform_indices = @transform_0, window_bounds = array<i64: 16, 128>}, {transform_indices = @transform_1, window_bounds = array<i64: 128, 128>}, {transform_indices = @transform_2, window_bounds = array<i64: 1, 128>}, {transform_indices = @transform_3, window_bounds = array<i64: 16, 128>}]} {
    %c0_i32 = arith.constant 0 : i32
    %0 = arith.cmpi eq, %arg2, %c0_i32 : i32
    %1 = arith.extui %0 : i1 to i32
    %c0_i32_0 = arith.constant 0 : i32
    %2 = arith.cmpi ne, %1, %c0_i32_0 : i32
    scf.if %2 {
      %cst_10 = arith.constant 0.000000e+00 : f32
      %12 = vector.broadcast %cst_10 : f32 to vector<16x128xf32>
      %c0_11 = arith.constant 0 : index
      %c0_12 = arith.constant 0 : index
      %13 = vector.load %arg7[%c0_11, %c0_12] : memref<16x128xf32, #tpu.memory_space<vmem>>, vector<16x128xf32>
      tpu.vector_store %arg7[%c0_11, %c0_12], %12 {strides = array<i32>} : memref<16x128xf32, #tpu.memory_space<vmem>>, vector<16x128xf32>,
    } else {
    }
    %c0 = arith.constant 0 : index
    %c0_1 = arith.constant 0 : index
    %3 = vector.load %arg7[%c0, %c0_1] : memref<16x128xf32, #tpu.memory_space<vmem>>, vector<16x128xf32>
    %c0_2 = arith.constant 0 : index
    %c0_3 = arith.constant 0 : index
    %4 = vector.load %arg3[%c0_2, %c0_3] : memref<16x128xbf16, #tpu.memory_space<vmem>>, vector<16x128xbf16>
    %c0_4 = arith.constant 0 : index
    %c0_5 = arith.constant 0 : index
    %5 = vector.load %arg4[%c0_4, %c0_5] : memref<128x128xbf16, #tpu.memory_space<vmem>>, vector<128x128xbf16>
    %cst = arith.constant dense<0.000000e+00> : vector<16x128xf32>
    %6 = tpu.matmul %4, %5, %cst {dimension_numbers = #tpu.dot_dimension_numbers<[1], [0], [0], [1], [0, 0, 1, 1], [], []>} : vector<16x128xbf16>, vector<128x128xbf16>, vector<16x128xf32> -> vector<16x128xf32>
    %7 = arith.addf %3, %6 : vector<16x128xf32>
    %c0_6 = arith.constant 0 : index
    %c0_7 = arith.constant 0 : index
    %8 = vector.load %arg7[%c0_6, %c0_7] : memref<16x128xf32, #tpu.memory_space<vmem>>, vector<16x128xf32>
    tpu.vector_store %arg7[%c0_6, %c0_7], %7 {strides = array<i32>} : memref<16x128xf32, #tpu.memory_space<vmem>>, vector<16x128xf32>,
    %c0_i32_8 = arith.constant 0 : i32
    %9 = arith.cmpi eq, %arg2, %c0_i32_8 : i32
    %10 = arith.extui %9 : i1 to i32
    %c0_i32_9 = arith.constant 0 : i32
    %11 = arith.cmpi ne, %10, %c0_i32_9 : i32
    scf.if %11 {
      %c0_10 = arith.constant 0 : index
      %c0_11 = arith.constant 0 : index
      %12 = vector.load %arg7[%c0_10, %c0_11] : memref<16x128xf32, #tpu.memory_space<vmem>>, vector<16x128xf32>
      %c0_12 = arith.constant 0 : index
      %c0_13 = arith.constant 0 : index
      %13 = vector.load %arg5[%c0_12, %c0_13] : memref<1x128xbf16, #tpu.memory_space<vmem>>, vector<1x128xbf16>
      %14 = arith.extf %13 : vector<1x128xbf16> to vector<1x128xf32>
      %15 = vector.broadcast %14 : vector<1x128xf32> to vector<16x128xf32>
      %16 = arith.addf %12, %15 : vector<16x128xf32>
      %cst_14 = arith.constant 0.000000e+00 : f32
      %17 = vector.broadcast %cst_14 : f32 to vector<16x128xf32>
      %18 = arith.maximumf %16, %17 : vector<16x128xf32>
      %19 = arith.truncf %18 : vector<16x128xf32> to vector<16x128xbf16>
      %c0_15 = arith.constant 0 : index
      %c0_16 = arith.constant 0 : index
      %20 = vector.load %arg6[%c0_15, %c0_16] : memref<16x128xbf16, #tpu.memory_space<vmem>>, vector<16x128xbf16>
      tpu.vector_store %arg6[%c0_15, %c0_16], %19 {strides = array<i32>} : memref<16x128xbf16, #tpu.memory_space<vmem>>, vector<16x128xbf16>,
    } else {
    }
    return
  }
  func.func @transform_0(%arg0: i32, %arg1: i32, %arg2: i32) -> (i32, i32) {
    %c0_i32 = arith.constant 0 : i32
    return %arg0, %arg2 : i32, i32
  }
  func.func @transform_1(%arg0: i32, %arg1: i32, %arg2: i32) -> (i32, i32) {
    %c0_i32 = arith.constant 0 : i32
    return %arg2, %arg1 : i32, i32
  }
  func.func @transform_2(%arg0: i32, %arg1: i32, %arg2: i32) -> (i32, i32) {
    %c0_i32 = arith.constant 0 : i32
    %c0_i32_0 = arith.constant 0 : i32
    return %c0_i32, %arg1 : i32, i32
  }
  func.func @transform_3(%arg0: i32, %arg1: i32, %arg2: i32) -> (i32, i32) {
    %c0_i32 = arith.constant 0 : i32
    return %arg0, %arg1 : i32, i32
  }
}

</mosaic_0001>

<bundles_post_ra>
// kernel: tpu_custom_call.1
= control target key start
LH: loop header
LB: loop body
LE: loop exit
PB: predicated region body
PF: predicated region fallthrough
CT: control target
= control target key end

     0   :  { %10 = vsyncpa [#allocation3], 0  ;;  %s514_s0 = inlined_call_operand.hbm [shape: bf16[16,128], index: 0, kind: input, shape index: {}]   ;;  %s515_s1 = inlined_call_operand.hbm [shape: bf16[128,128], index: 1, kind: input, shape index: {}]   ;;  %s516_s2 = inlined_call_operand.vmem [shape: bf16[1,128], index: 2, kind: input, shape index: {}]   ;;  %s517_s3 = inlined_call_operand.hbm [shape: bf16[128,128], index: 3, kind: input, shape index: {}]   ;;  %s518_s4 = inlined_call_operand.vmem [shape: bf16[1,128], index: 4, kind: input, shape index: {}]   ;;  %s519_s5 = inlined_call_operand.hbm [shape: f32[16,128], index: 5, kind: output, shape index: {}]  }
   0x1   :  { %11 = vsyncpa [#allocation6], 0 }
   0x2   :  { %12 = vsyncpa [#allocation4], 0  ;;  %s30_s20 = sshll.u32 %s515_s1, 4  ;;  %s458_s21 = smov [#allocation5]   ;;  %s31_s20 = int_to_ptr.hbm [resolvable:$true] %s30_s20 }
   0x3   :  { %s32_s22 = sshll.u32 %s458_s21, 4  ;;  %s17_s25 = sshll.u32 %s514_s0, 4  ;;  %s33_s22 = int_to_ptr.vmem [resolvable:$true] %s32_s22  ;;  %s18_s25 = int_to_ptr.hbm [resolvable:$true] %s17_s25 }
   0x4   :  { %s459_s26 = smov 64   ;;  %s460_s27 = smov 4  }
   0x5   :  { %38 = dma.hbm_to_vmem [thread:$0]  %s31_s20, 1024, %s33_s22, [#allocation6], %s459_s26, %s459_s26, %s460_s27  }
   0x6   :  { %s461_s28 = smov [#allocation2]   ;;  %s45_s7 = sshll.u32 %s517_s3, 4  ;;  %s46_s7 = int_to_ptr.hbm [resolvable:$true] %s45_s7 }
   0x7   :  { %s19_s29 = sshll.u32 %s461_s28, 4  ;;  %s462_s1 = smov [#allocation7]   ;;  %s20_s29 = int_to_ptr.vmem [resolvable:$true] %s19_s29 }
   0x8   :  { %25 = dma.hbm_to_vmem [thread:$0]  %s18_s25, 128, %s20_s29, [#allocation3], %s459_s26, %s459_s26, %s460_s27  }
   0x9   :  { %s47_s8 = sshll.u32 %s462_s1, 4  ;;  %s48_s8 = int_to_ptr.vmem [resolvable:$true] %s47_s8 }
   0xa   :  { %53 = dma.hbm_to_vmem [thread:$0]  %s46_s7, 1024, %s48_s8, [#allocation6], %s459_s26, %s459_s26, %s460_s27  }
   0xb   :  { %452 = dma.done.wait [#allocation3], 128  }
   0xc   :  { %453 = vsyncadd [#allocation3], 4294967168 }
   0xd   :  { %454 = dma.done.wait [#allocation6], 2048  }
   0xe   :  { %455 = vsyncadd [#allocation6], 4294965248  ;;  %v339_v0 = vld [vmem:[#allocation5 + $0x38] sm:$0xff]  ;;  %v338_v1 = vld [vmem:[#allocation5 + $0x30] sm:$0xff]  ;;  %s249_s14 = sshll.u32 %s519_s5, 4  ;;  %s464_s15 = smov 128   ;;  %s250_s14 = int_to_ptr.hbm [resolvable:$true] %s249_s14 }
   0xf   :  { %143 = vmatpush.bf16.msra.mxu0 %v339_v0  ;;  %v347_v2 = vld [vmem:[#allocation7 + $0x38] sm:$0xff]  ;;  %v346_v3 = vld [vmem:[#allocation7 + $0x30] sm:$0xff]  ;;  %v337_v4 = vld [vmem:[#allocation5 + $0x28] sm:$0xff]  ;;  %s465_s16 = smov 8  }
  0x10   :  { %227 = vmatpush.bf16.msra.mxu1 %v347_v2  ;;  %v345_v5 = vld [vmem:[#allocation7 + $0x28] sm:$0xff]  ;;  %v336_v6 = vld [vmem:[#allocation5 + $0x20] sm:$0xff]  ;;  %v335_v8 = vld [vmem:[#allocation5 + $0x18] sm:$0xff] }
  0x11   :  { %v344_v7 = vld [vmem:[#allocation7 + $0x20] sm:$0xff]  ;;  %v334_v9 = vld [vmem:[#allocation5 + $0x10] sm:$0xff]  ;;  %v333_v10 = vld [vmem:[#allocation5 + $0x8] sm:$0xff] }
  0x12   :  { %v332_v11 = vld [vmem:[#allocation5] sm:$0xff]  ;;  %v331_v12 = vld [vmem:[#allocation2] sm:$0xff]  ;;  %v342_v14 = vld [vmem:[#allocation7 + $0x10] sm:$0xff] }
  0x13   :  { %144 = vmatpush.bf16.msra.mxu0 %v338_v1  ;;  %v343_v13 = vld [vmem:[#allocation7 + $0x18] sm:$0xff]  ;;  %v341_v15 = vld [vmem:[#allocation7 + $0x8] sm:$0xff]  ;;  %v340_v16 = vld [vmem:[#allocation7] sm:$0xff] }
  0x14   :  { %228 = vmatpush.bf16.msra.mxu1 %v346_v3  ;;  %v86_v17 = vld [vmem:[%s516_s2] sm:$0x1]  ;;  %s463_s2 = smov [#allocation8]  }
  0x15   :  { %v87_v18 = vunpack.c.l.bf16 %v86_v17  ;;  %v176_v27 = vld [vmem:[%s518_s4] sm:$0x1]  ;;  %s247_s11 = sshll.u32 %s463_s2, 4  ;;  %s248_s11 = int_to_ptr.vmem [resolvable:$true] %s247_s11 }
  0x16   :  { %v177_v28 = vunpack.c.l.bf16 %v176_v27 }
  0x17   :  { %145 = vmatpush.bf16.msra.mxu0 %v337_v4  ;;  %v88_v20 = vperm.slane %v87_v18, 0 }
  0x18   :  { %229 = vmatpush.bf16.msra.mxu1 %v345_v5  ;;  %v178_v29 = vperm.slane %v177_v28, 0 }
  0x1b   :  { %146 = vmatpush.bf16.msra.mxu0 %v336_v6 }
  0x1c   :  { %230 = vmatpush.bf16.msra.mxu1 %v344_v7 }
  0x1f   :  { %147 = vmatpush.bf16.msra.mxu0 %v335_v8 }
  0x20   :  { %231 = vmatpush.bf16.msra.mxu1 %v343_v13 }
  0x23   :  { %148 = vmatpush.bf16.msra.mxu0 %v334_v9 }
  0x24   :  { %232 = vmatpush.bf16.msra.mxu1 %v342_v14 }
  0x27   :  { %149 = vmatpush.bf16.msra.mxu0 %v333_v10 }
  0x28   :  { %233 = vmatpush.bf16.msra.mxu1 %v341_v15 }
  0x2b   :  { %150 = vmatpush.bf16.msra.mxu0 %v332_v11 }
  0x2c   :  { %234 = vmatpush.bf16.msra.mxu1 %v340_v16 }
  0x2e   :  { %151 = vmatmul.bf16.vlgmr.msra.gmra.mxu0 %v331_v12 }
  0xab   :  { %v152_v19 = vpop.f32.mrf.mxu0 }
  0xac   :  { %v153_v21 = vadd.f32 %v152_v19, %v88_v20 }
  0xae   :  { %v157_v24 = vmax.f32 %v153_v21, 0.0 }
  0xb3   :  { %v154_v22 = vpop.f32.mrf.mxu0 }
  0xb4   :  { %v155_v23 = vadd.f32 %v154_v22, %v88_v20 }
  0xb6   :  { %v158_v25 = vmax.f32 %v155_v23, 0.0 }
  0xb8   :  { %v159_v26 = vpack.c.bf16 %v158_v25, %v157_v24 }
  0xba   :  { %235 = vmatmul.bf16.vlgmr.msra.gmra.mxu1 %v159_v26 }
 0x137   :  { %v236_v30 = vpop.f32.mrf.mxu1 }
 0x138   :  { %v237_v31 = vadd.f32 %v236_v30, %v178_v29 }
 0x13a   :  { %241 = vst [vmem:[#allocation8] sm:$0xff] %v237_v31 }
 0x13f   :  { %v238_v32 = vpop.f32.mrf.mxu1 }
 0x140   :  { %v239_v33 = vadd.f32 %v238_v32, %v178_v29 }
 0x142   :  { %242 = vst [vmem:[#allocation8 + $0x8] sm:$0xff] %v239_v33 }
 0x143   :  { %255 = dma.vmem_to_hbm [thread:$0]  %s248_s11, 256, %s250_s14, [#allocation4], %s464_s15, %s464_s15, %s465_s16  }
 0x144   :  { %456 = dma.done.wait [#allocation4], 256  }
 0x145   :  { %457 = vsyncadd [#allocation4], 4294967040 }
 0x146   :  { %260 = vsyncpa [#allocation3], 1 }
 0x147   :  { %261 = vsyncpa [#allocation6], 1 }
 0x148   :  { %262 = vsyncpa [#allocation4], 1 }

// kernel: tpu_custom_call.1
= control target key start
LH: loop header
LB: loop body
LE: loop exit
PB: predicated region body
PF: predicated region fallthrough
CT: control target
= control target key end

     0   :  { %10 = vsyncpa [#allocation3], 0  ;;  %s514_s0 = inlined_call_operand.hbm [shape: bf16[16,128], index: 0, kind: input, shape index: {}]   ;;  %s515_s1 = inlined_call_operand.hbm [shape: bf16[128,128], index: 1, kind: input, shape index: {}]   ;;  %s516_s2 = inlined_call_operand.vmem [shape: bf16[1,128], index: 2, kind: input, shape index: {}]   ;;  %s517_s3 = inlined_call_operand.hbm [shape: bf16[128,128], index: 3, kind: input, shape index: {}]   ;;  %s518_s4 = inlined_call_operand.vmem [shape: bf16[1,128], index: 4, kind: input, shape index: {}]   ;;  %s519_s5 = inlined_call_operand.hbm [shape: f32[16,128], index: 5, kind: output, shape index: {}]  }
   0x1   :  { %11 = vsyncpa [#allocation6], 0 }
   0x2   :  { %12 = vsyncpa [#allocation4], 0  ;;  %s30_s20 = sshll.u32 %s515_s1, 4  ;;  %s458_s21 = smov [#allocation5]   ;;  %s31_s20 = int_to_ptr.hbm [resolvable:$true] %s30_s20 }
   0x3   :  { %s32_s22 = sshll.u32 %s458_s21, 4  ;;  %s17_s25 = sshll.u32 %s514_s0, 4  ;;  %s33_s22 = int_to_ptr.vmem [resolvable:$true] %s32_s22  ;;  %s18_s25 = int_to_ptr.hbm [resolvable:$true] %s17_s25 }
   0x4   :  { %s459_s26 = smov 64   ;;  %s460_s27 = smov 4  }
   0x5   :  { %38 = dma.hbm_to_vmem [thread:$0]  %s31_s20, 1024, %s33_s22, [#allocation6], %s459_s26, %s459_s26, %s460_s27  }
   0x6   :  { %s461_s28 = smov [#allocation2]   ;;  %s45_s7 = sshll.u32 %s517_s3, 4  ;;  %s46_s7 = int_to_ptr.hbm [resolvable:$true] %s45_s7 }
   0x7   :  { %s19_s29 = sshll.u32 %s461_s28, 4  ;;  %s462_s1 = smov [#allocation7]   ;;  %s20_s29 = int_to_ptr.vmem [resolvable:$true] %s19_s29 }
   0x8   :  { %25 = dma.hbm_to_vmem [thread:$0]  %s18_s25, 128, %s20_s29, [#allocation3], %s459_s26, %s459_s26, %s460_s27  }
   0x9   :  { %s47_s8 = sshll.u32 %s462_s1, 4  ;;  %s48_s8 = int_to_ptr.vmem [resolvable:$true] %s47_s8 }
   0xa   :  { %53 = dma.hbm_to_vmem [thread:$0]  %s46_s7, 1024, %s48_s8, [#allocation6], %s459_s26, %s459_s26, %s460_s27  }
   0xb   :  { %452 = dma.done.wait [#allocation3], 128  }
   0xc   :  { %453 = vsyncadd [#allocation3], 4294967168 }
   0xd   :  { %454 = dma.done.wait [#allocation6], 2048  }
   0xe   :  { %455 = vsyncadd [#allocation6], 4294965248  ;;  %v339_v0 = vld [vmem:[#allocation5 + $0x38] sm:$0xff]  ;;  %v338_v1 = vld [vmem:[#allocation5 + $0x30] sm:$0xff]  ;;  %s249_s14 = sshll.u32 %s519_s5, 4  ;;  %s464_s15 = smov 128   ;;  %s250_s14 = int_to_ptr.hbm [resolvable:$true] %s249_s14 }
   0xf   :  { %143 = vmatpush.bf16.msra.mxu0 %v339_v0  ;;  %v347_v2 = vld [vmem:[#allocation7 + $0x38] sm:$0xff]  ;;  %v346_v3 = vld [vmem:[#allocation7 + $0x30] sm:$0xff]  ;;  %v337_v4 = vld [vmem:[#allocation5 + $0x28] sm:$0xff]  ;;  %s465_s16 = smov 8  }
  0x10   :  { %227 = vmatpush.bf16.msra.mxu1 %v347_v2  ;;  %v345_v5 = vld [vmem:[#allocation7 + $0x28] sm:$0xff]  ;;  %v336_v6 = vld [vmem:[#allocation5 + $0x20] sm:$0xff]  ;;  %v335_v8 = vld [vmem:[#allocation5 + $0x18] sm:$0xff] }
  0x11   :  { %v344_v7 = vld [vmem:[#allocation7 + $0x20] sm:$0xff]  ;;  %v334_v9 = vld [vmem:[#allocation5 + $0x10] sm:$0xff]  ;;  %v333_v10 = vld [vmem:[#allocation5 + $0x8] sm:$0xff] }
  0x12   :  { %v332_v11 = vld [vmem:[#allocation5] sm:$0xff]  ;;  %v331_v12 = vld [vmem:[#allocation2] sm:$0xff]  ;;  %v342_v14 = vld [vmem:[#allocation7 + $0x10] sm:$0xff] }
  0x13   :  { %144 = vmatpush.bf16.msra.mxu0 %v338_v1  ;;  %v343_v13 = vld [vmem:[#allocation7 + $0x18] sm:$0xff]  ;;  %v341_v15 = vld [vmem:[#allocation7 + $0x8] sm:$0xff]  ;;  %v340_v16 = vld [vmem:[#allocation7] sm:$0xff] }
  0x14   :  { %228 = vmatpush.bf16.msra.mxu1 %v346_v3  ;;  %v86_v17 = vld [vmem:[%s516_s2] sm:$0x1]  ;;  %s463_s2 = smov [#allocation8]  }
  0x15   :  { %v87_v18 = vunpack.c.l.bf16 %v86_v17  ;;  %v176_v27 = vld [vmem:[%s518_s4] sm:$0x1]  ;;  %s247_s11 = sshll.u32 %s463_s2, 4  ;;  %s248_s11 = int_to_ptr.vmem [resolvable:$true] %s247_s11 }
  0x16   :  { %v177_v28 = vunpack.c.l.bf16 %v176_v27 }
  0x17   :  { %145 = vmatpush.bf16.msra.mxu0 %v337_v4  ;;  %v88_v20 = vperm.slane %v87_v18, 0 }
  0x18   :  { %229 = vmatpush.bf16.msra.mxu1 %v345_v5  ;;  %v178_v29 = vperm.slane %v177_v28, 0 }
  0x1b   :  { %146 = vmatpush.bf16.msra.mxu0 %v336_v6 }
  0x1c   :  { %230 = vmatpush.bf16.msra.mxu1 %v344_v7 }
  0x1f   :  { %147 = vmatpush.bf16.msra.mxu0 %v335_v8 }
  0x20   :  { %231 = vmatpush.bf16.msra.mxu1 %v343_v13 }
  0x23   :  { %148 = vmatpush.bf16.msra.mxu0 %v334_v9 }
  0x24   :  { %232 = vmatpush.bf16.msra.mxu1 %v342_v14 }
  0x27   :  { %149 = vmatpush.bf16.msra.mxu0 %v333_v10 }
  0x28   :  { %233 = vmatpush.bf16.msra.mxu1 %v341_v15 }
  0x2b   :  { %150 = vmatpush.bf16.msra.mxu0 %v332_v11 }
  0x2c   :  { %234 = vmatpush.bf16.msra.mxu1 %v340_v16 }
  0x2e   :  { %151 = vmatmul.bf16.vlgmr.msra.gmra.mxu0 %v331_v12 }
  0xab   :  { %v152_v19 = vpop.f32.mrf.mxu0 }
  0xac   :  { %v153_v21 = vadd.f32 %v152_v19, %v88_v20 }
  0xae   :  { %v157_v24 = vmax.f32 %v153_v21, 0.0 }
  0xb3   :  { %v154_v22 = vpop.f32.mrf.mxu0 }
  0xb4   :  { %v155_v23 = vadd.f32 %v154_v22, %v88_v20 }
  0xb6   :  { %v158_v25 = vmax.f32 %v155_v23, 0.0 }
  0xb8   :  { %v159_v26 = vpack.c.bf16 %v158_v25, %v157_v24 }
  0xba   :  { %235 = vmatmul.bf16.vlgmr.msra.gmra.mxu1 %v159_v26 }
 0x137   :  { %v236_v30 = vpop.f32.mrf.mxu1 }
 0x138   :  { %v237_v31 = vadd.f32 %v236_v30, %v178_v29 }
 0x13a   :  { %241 = vst [vmem:[#allocation8] sm:$0xff] %v237_v31 }
 0x13f   :  { %v238_v32 = vpop.f32.mrf.mxu1 }
 0x140   :  { %v239_v33 = vadd.f32 %v238_v32, %v178_v29 }
 0x142   :  { %242 = vst [vmem:[#allocation8 + $0x8] sm:$0xff] %v239_v33 }
 0x143   :  { %255 = dma.vmem_to_hbm [thread:$0]  %s248_s11, 256, %s250_s14, [#allocation4], %s464_s15, %s464_s15, %s465_s16  }
 0x144   :  { %456 = dma.done.wait [#allocation4], 256  }
 0x145   :  { %457 = vsyncadd [#allocation4], 4294967040 }
 0x146   :  { %260 = vsyncpa [#allocation3], 1 }
 0x147   :  { %261 = vsyncpa [#allocation6], 1 }
 0x148   :  { %262 = vsyncpa [#allocation4], 1 }

// kernel: tpu_custom_call.1
= control target key start
LH: loop header
LB: loop body
LE: loop exit
PB: predicated region body
PF: predicated region fallthrough
CT: control target
= control target key end

     0   :  { %8 = vsyncpa [#allocation4], 0  ;;  %s360_s0 = inlined_call_operand.hbm [shape: bf16[16,128], index: 0, kind: input, shape index: {}]   ;;  %s361_s1 = inlined_call_operand.hbm [shape: bf16[128,128], index: 1, kind: input, shape index: {}]   ;;  %s362_s2 = inlined_call_operand.vmem [shape: bf16[1,128], index: 2, kind: input, shape index: {}]   ;;  %s363_s3 = inlined_call_operand.hbm [shape: bf16[16,128], index: 3, kind: output, shape index: {}]  }
   0x1   :  { %9 = vsyncpa [#allocation7], 0 }
   0x2   :  { %10 = vsyncpa [#allocation5], 0  ;;  %s15_s14 = sshll.u32 %s360_s0, 4  ;;  %s314_s15 = smov [#allocation3]   ;;  %s16_s14 = int_to_ptr.hbm [resolvable:$true] %s15_s14 }
   0x3   :  { %s17_s16 = sshll.u32 %s314_s15, 4  ;;  %s28_s19 = sshll.u32 %s361_s1, 4  ;;  %s18_s16 = int_to_ptr.vmem [resolvable:$true] %s17_s16  ;;  %s29_s19 = int_to_ptr.hbm [resolvable:$true] %s28_s19 }
   0x4   :  { %s315_s20 = smov 64   ;;  %s316_s21 = smov 4  }
   0x5   :  { %23 = dma.hbm_to_vmem [thread:$0]  %s16_s14, 128, %s18_s16, [#allocation4], %s315_s20, %s315_s20, %s316_s21  }
   0x6   :  { %s317_s22 = smov [#allocation6]  }
   0x7   :  { %s30_s23 = sshll.u32 %s317_s22, 4  ;;  %s31_s23 = int_to_ptr.vmem [resolvable:$true] %s30_s23 }
   0x8   :  { %36 = dma.hbm_to_vmem [thread:$0]  %s29_s19, 1024, %s31_s23, [#allocation7], %s315_s20, %s315_s20, %s316_s21  }
   0x9   :  { %308 = dma.done.wait [#allocation4], 128  }
   0xa   :  { %309 = vsyncadd [#allocation4], 4294967168 }
   0xb   :  { %310 = dma.done.wait [#allocation7], 1024  }
   0xc   :  { %311 = vsyncadd [#allocation7], 4294966272  ;;  %v225_v0 = vld [vmem:[#allocation6 + $0x38] sm:$0xff]  ;;  %v224_v1 = vld [vmem:[#allocation6 + $0x30] sm:$0xff]  ;;  %s318_s24 = smov [#allocation8]   ;;  %s167_s28 = sshll.u32 %s363_s3, 4  ;;  %s168_s28 = int_to_ptr.hbm [resolvable:$true] %s167_s28 }
   0xd   :  { %127 = vmatpush.bf16.msra.mxu0 %v225_v0  ;;  %v223_v2 = vld [vmem:[#allocation6 + $0x28] sm:$0xff]  ;;  %v222_v3 = vld [vmem:[#allocation6 + $0x20] sm:$0xff]  ;;  %v221_v4 = vld [vmem:[#allocation6 + $0x18] sm:$0xff]  ;;  %s165_s25 = sshll.u32 %s318_s24, 4  ;;  %s166_s25 = int_to_ptr.vmem [resolvable:$true] %s165_s25 }
   0xe   :  { %v220_v5 = vld [vmem:[#allocation6 + $0x10] sm:$0xff]  ;;  %v219_v6 = vld [vmem:[#allocation6 + $0x8] sm:$0xff]  ;;  %v218_v7 = vld [vmem:[#allocation6] sm:$0xff] }
   0xf   :  { %v217_v8 = vld [vmem:[#allocation3] sm:$0xff] }
  0x10   :  { %v150_v9 = vld [vmem:[%s362_s2] sm:$0x1] }
  0x11   :  { %128 = vmatpush.bf16.msra.mxu0 %v224_v1  ;;  %v151_v10 = vunpack.c.l.bf16 %v150_v9 }
  0x13   :  { %v152_v12 = vperm.slane %v151_v10, 0 }
  0x15   :  { %129 = vmatpush.bf16.msra.mxu0 %v223_v2 }
  0x19   :  { %130 = vmatpush.bf16.msra.mxu0 %v222_v3 }
  0x1d   :  { %131 = vmatpush.bf16.msra.mxu0 %v221_v4 }
  0x21   :  { %132 = vmatpush.bf16.msra.mxu0 %v220_v5 }
  0x25   :  { %133 = vmatpush.bf16.msra.mxu0 %v219_v6 }
  0x29   :  { %134 = vmatpush.bf16.msra.mxu0 %v218_v7 }
  0x2c   :  { %135 = vmatmul.bf16.vlgmr.msra.gmra.mxu0 %v217_v8 }
  0xa9   :  { %v136_v11 = vpop.f32.mrf.mxu0 }
  0xaa   :  { %v153_v13 = vadd.f32 %v152_v12, %v136_v11 }
  0xac   :  { %v155_v16 = vmax.f32 %v153_v13, 0.0 }
  0xb1   :  { %v138_v14 = vpop.f32.mrf.mxu0 }
  0xb2   :  { %v154_v15 = vadd.f32 %v152_v12, %v138_v14 }
  0xb4   :  { %v156_v17 = vmax.f32 %v154_v15, 0.0 }
  0xb6   :  { %v229_v18 = vpack.c.bf16 %v156_v17, %v155_v16 }
  0xb8   :  { %230 = vst [vmem:[#allocation8] sm:$0xff] %v229_v18  }
  0xb9   :  { %173 = dma.vmem_to_hbm [thread:$0]  %s166_s25, 128, %s168_s28, [#allocation5], %s315_s20, %s315_s20, %s316_s21  }
  0xba   :  { %312 = dma.done.wait [#allocation5], 128  }
  0xbb   :  { %313 = vsyncadd [#allocation5], 4294967168 }
  0xbc   :  { %178 = vsyncpa [#allocation4], 1 }
  0xbd   :  { %179 = vsyncpa [#allocation7], 1 }
  0xbe   :  { %180 = vsyncpa [#allocation5], 1 }

</bundles_post_ra>
